<compile_context>
chip_gen: v7x
topology: tpu7x:2x2x1
jax: 0.10.0
libtpu: 0.0.40
codegen_flags: <defaults>
</compile_context>

<pallas_src>
import functools
import math

import jax
import jax.numpy as jnp
from jax import lax
from jax.experimental import pallas as pl
from jax.experimental.pallas import tpu as pltpu


def _label_smoothing_kernel(tgt_ref, x_ref, out_ref, *,
                            padding_idx, confidence, smooth_val, const_term):
    # Zero the per-chunk accumulator at the start of the inner (reduction) axis.
    @pl.when(pl.program_id(1) == 0)
    def _():
        out_ref[...] = jnp.zeros_like(out_ref)

    x = x_ref[...].astype(jnp.float32)            # (tile_n, V)
    tgt = tgt_ref[...]                            # (tile_n, 1) int32
    tn, v = x.shape

    col = lax.broadcasted_iota(jnp.int32, (tn, v), 1)

    # Per-element weight w = -true_dist  (3 compile-time-known values).
    w = jnp.where(col == tgt, jnp.float32(-confidence), jnp.float32(-smooth_val))
    w = jnp.where(col == padding_idx, jnp.float32(0.0), w)

    # row_loss = sum_v t*(log t - x) = const_term + sum_v w*x   (per valid row)
    row_loss = jnp.sum(w * x, axis=-1, keepdims=True) + jnp.float32(const_term)
    # Rows whose target is the padding index contribute nothing.
    row_loss = jnp.where(tgt == padding_idx, jnp.float32(0.0), row_loss)

    out_ref[...] += row_loss                      # elementwise VPU accumulate


def label_smoothing_loss(x, target, *, size, padding_idx, smoothing,
                         tile_n=None, num_chunks=2):
    """Pallas equivalent of LabelSmoothing.forward(x, target) -> scalar loss."""
    n, v = x.shape
    assert v == size, "x.shape[1] must equal `size`"

    itemsize = jnp.dtype(x.dtype).itemsize

    if tile_n is None:
        # ~4 MiB per x buffer (double-buffered -> ~8 MiB), safe on every
        # generation's scoped-VMEM default, multiple of 16 for bf16 packing.
        budget = 4 * 1024 * 1024
        tile_n = budget // (v * itemsize)
        tile_n = int(max(16, min(2048, (tile_n // 16) * 16)))
        # Don't over-pad tiny inputs.
        rows_per_chunk = pl.cdiv(n, num_chunks)
        min_tile = ((rows_per_chunk + 15) // 16) * 16
        tile_n = min(tile_n, max(16, min_tile))
    # TODO(synk): for very large vocabularies also tile the V axis (2D grid)
    # instead of shrinking tile_n.

    tiles_per_chunk = pl.cdiv(n, tile_n * num_chunks)
    n_pad = num_chunks * tiles_per_chunk * tile_n

    target = target.astype(jnp.int32)
    if n_pad != n:
        # Padded rows get target == padding_idx -> zero contribution.
        x = jnp.pad(x, ((0, n_pad - n), (0, 0)))
        target = jnp.pad(target, (0, n_pad - n), constant_values=padding_idx)
    tgt2d = target.reshape(n_pad, 1)

    confidence = 1.0 - smoothing
    smooth_val = smoothing / (size - 2)
    const_term = 0.0                      # sum_v t*log(t) for one valid row
    if confidence > 0.0:
        const_term += confidence * math.log(confidence)
    if smooth_val > 0.0:
        const_term += (size - 2) * smooth_val * math.log(smooth_val)

    kernel = functools.partial(_label_smoothing_kernel,
                               padding_idx=padding_idx,
                               confidence=confidence,
                               smooth_val=smooth_val,
                               const_term=const_term)

    partials = pl.pallas_call(
        kernel,
        out_shape=jax.ShapeDtypeStruct((num_chunks * tile_n, 1), jnp.float32),
        grid_spec=pltpu.PrefetchScalarGridSpec(
            num_scalar_prefetch=0,
            grid=(num_chunks, tiles_per_chunk),
            in_specs=[
                pl.BlockSpec((tile_n, 1),
                             lambda c, t: (c * tiles_per_chunk + t, 0)),  # target
                pl.BlockSpec((tile_n, v),
                             lambda c, t: (c * tiles_per_chunk + t, 0)),  # x
            ],
            # Per-chunk partial accumulator (distinct block per parallel chunk).
            out_specs=pl.BlockSpec((tile_n, 1), lambda c, t: (c, 0)),
        ),
        compiler_params=pltpu.CompilerParams(
            dimension_semantics=("parallel", "arbitrary"),
            vmem_limit_bytes=32 * 1024 * 1024),
    )(tgt2d, x)

    return jnp.sum(partials)


def _reference_loss(x, target, *, size, padding_idx, smoothing):
    """Pure-JAX reference mirroring the PyTorch module (elementwise form)."""
    n, v = x.shape
    confidence = 1.0 - smoothing
    true_dist = jnp.full((n, v), smoothing / (size - 2), dtype=jnp.float32)
    true_dist = true_dist.at[jnp.arange(n), target].set(confidence)
    true_dist = true_dist.at[:, padding_idx].set(0.0)
    row_mask = (target == padding_idx)[:, None]
    true_dist = jnp.where(row_mask, 0.0, true_dist)
    safe_t = jnp.where(true_dist > 0, true_dist, 1.0)
    elem = jnp.where(true_dist > 0, true_dist * (jnp.log(safe_t) - x), 0.0)
    return jnp.sum(elem)


if __name__ == "__main__":
    SIZE = 32          # vocab size (x.size(1))
    PADDING_IDX = 0
    SMOOTHING = 0.1
    N = 8              # number of tokens / rows

    key = jax.random.PRNGKey(0)
    k_logits, k_tgt = jax.random.split(key)

    logits = jax.random.normal(k_logits, (N, SIZE), dtype=jnp.float32)
    x = jax.nn.log_softmax(logits, axis=-1)     # KLDivLoss expects log-probs

    target = jax.random.randint(k_tgt, (N,), 0, SIZE, dtype=jnp.int32)
    # force a couple of padding targets to exercise the row-zeroing path
    target = target.at[1].set(PADDING_IDX).at[5].set(PADDING_IDX)

    loss = label_smoothing_loss(x, target,
                                size=SIZE,
                                padding_idx=PADDING_IDX,
                                smoothing=SMOOTHING)
    loss = jax.block_until_ready(loss)

    ref = _reference_loss(x, target,
                          size=SIZE,
                          padding_idx=PADDING_IDX,
                          smoothing=SMOOTHING)
    assert jnp.allclose(loss, ref, atol=1e-4, rtol=1e-5), (loss, ref)

    print("KERNEL_OK")
</pallas_src>

<mosaic_0001>
module attributes {stable_mosaic.version = 11 : i64} {
  func.func @_label_smoothing_kernel(%arg0: i32, %arg1: i32, %arg2: memref<16x1xi32, #tpu.memory_space<vmem>>, %arg3: memref<16x32xf32, #tpu.memory_space<vmem>>, %arg4: memref<16x1xf32, #tpu.memory_space<vmem>>) attributes {dimension_semantics = [#tpu.dimension_semantics<parallel>, #tpu.dimension_semantics<arbitrary>], iteration_bounds = array<i64: 2, 1>, scalar_prefetch = 0 : i64, scratch_operands = 0 : i64, tpu.core_type = #tpu.core_type<tc>, window_params = [{transform_indices = @transform_0, window_bounds = array<i64: 16, 1>}, {transform_indices = @transform_1, window_bounds = array<i64: 16, 32>}, {transform_indices = @transform_2, window_bounds = array<i64: 16, 1>}]} {
    %c0_i32 = arith.constant 0 : i32
    %0 = arith.cmpi eq, %arg1, %c0_i32 : i32
    %1 = arith.extui %0 : i1 to i32
    %c0_i32_0 = arith.constant 0 : i32
    %2 = arith.cmpi ne, %1, %c0_i32_0 : i32
    scf.if %2 {
      %cst_15 = arith.constant 0.000000e+00 : f32
      %27 = vector.broadcast %cst_15 : f32 to vector<16x1xf32>
      %c0_16 = arith.constant 0 : index
      %c0_17 = arith.constant 0 : index
      %28 = vector.load %arg4[%c0_16, %c0_17] : memref<16x1xf32, #tpu.memory_space<vmem>>, vector<16x1xf32>
      tpu.vector_store %arg4[%c0_16, %c0_17], %27 {strides = array<i32>} : memref<16x1xf32, #tpu.memory_space<vmem>>, vector<16x1xf32>,
    } else {
    }
    %c0 = arith.constant 0 : index
    %c0_1 = arith.constant 0 : index
    %3 = vector.load %arg3[%c0, %c0_1] : memref<16x32xf32, #tpu.memory_space<vmem>>, vector<16x32xf32>
    %c0_2 = arith.constant 0 : index
    %c0_3 = arith.constant 0 : index
    %4 = vector.load %arg2[%c0_2, %c0_3] : memref<16x1xi32, #tpu.memory_space<vmem>>, vector<16x1xi32>
    %5 = tpu.iota {dimensions = array<i32: 1>} : vector<16x32xi32>
    %6 = vector.broadcast %4 : vector<16x1xi32> to vector<16x32xi32>
    %7 = arith.cmpi eq, %5, %6 : vector<16x32xi32>
    %cst = arith.constant -0.899999976 : f32
    %cst_4 = arith.constant -0.00333333341 : f32
    %8 = vector.broadcast %cst : f32 to vector<16x32xf32>
    %9 = vector.broadcast %cst_4 : f32 to vector<16x32xf32>
    %10 = arith.select %7, %8, %9 : vector<16x32xi1>, vector<16x32xf32>
    %c0_i32_5 = arith.constant 0 : i32
    %11 = vector.broadcast %c0_i32_5 : i32 to vector<16x32xi32>
    %12 = arith.cmpi eq, %5, %11 : vector<16x32xi32>
    %cst_6 = arith.constant 0.000000e+00 : f32
    %13 = vector.broadcast %cst_6 : f32 to vector<16x32xf32>
    %14 = arith.select %12, %13, %10 : vector<16x32xi1>, vector<16x32xf32>
    %15 = arith.mulf %14, %3 : vector<16x32xf32>
    %cst_7 = arith.constant dense<0.000000e+00> : vector<16xf32>
    %16 = vector.multi_reduction <add>, %15, %cst_7 [1] : vector<16x32xf32> to vector<16xf32>
    %17 = vector.shape_cast %16 : vector<16xf32> to vector<16x1xf32>
    %cst_8 = arith.constant -0.665202737 : f32
    %18 = vector.broadcast %cst_8 : f32 to vector<16x1xf32>
    %19 = arith.addf %17, %18 : vector<16x1xf32>
    %c0_i32_9 = arith.constant 0 : i32
    %20 = vector.broadcast %c0_i32_9 : i32 to vector<16x1xi32>
    %21 = arith.cmpi eq, %4, %20 : vector<16x1xi32>
    %cst_10 = arith.constant 0.000000e+00 : f32
    %22 = vector.broadcast %cst_10 : f32 to vector<16x1xf32>
    %23 = arith.select %21, %22, %19 : vector<16x1xi1>, vector<16x1xf32>
    %c0_11 = arith.constant 0 : index
    %c0_12 = arith.constant 0 : index
    %24 = vector.load %arg4[%c0_11, %c0_12] : memref<16x1xf32, #tpu.memory_space<vmem>>, vector<16x1xf32>
    %25 = arith.addf %24, %23 : vector<16x1xf32>
    %c0_13 = arith.constant 0 : index
    %c0_14 = arith.constant 0 : index
    %26 = vector.load %arg4[%c0_13, %c0_14] : memref<16x1xf32, #tpu.memory_space<vmem>>, vector<16x1xf32>
    tpu.vector_store %arg4[%c0_13, %c0_14], %25 {strides = array<i32>} : memref<16x1xf32, #tpu.memory_space<vmem>>, vector<16x1xf32>,
    return
  }
  func.func @transform_0(%arg0: i32, %arg1: i32) -> (i32, i32) {
    %c1_i32 = arith.constant 1 : i32
    %0 = arith.muli %arg0, %c1_i32 : i32
    %1 = arith.addi %0, %arg1 : i32
    %c0_i32 = arith.constant 0 : i32
    %c0_i32_0 = arith.constant 0 : i32
    return %1, %c0_i32 : i32, i32
  }
  func.func @transform_1(%arg0: i32, %arg1: i32) -> (i32, i32) {
    %c1_i32 = arith.constant 1 : i32
    %0 = arith.muli %arg0, %c1_i32 : i32
    %1 = arith.addi %0, %arg1 : i32
    %c0_i32 = arith.constant 0 : i32
    %c0_i32_0 = arith.constant 0 : i32
    return %1, %c0_i32 : i32, i32
  }
  func.func @transform_2(%arg0: i32, %arg1: i32) -> (i32, i32) {
    %c0_i32 = arith.constant 0 : i32
    %c0_i32_0 = arith.constant 0 : i32
    return %arg0, %c0_i32 : i32, i32
  }
}

</mosaic_0001>

<bundles_post_ra>
// kernel: tpu_custom_call.1
= control target key start
LH: loop header
LB: loop body
LE: loop exit
PB: predicated region body
PF: predicated region fallthrough
CT: control target
= control target key end

     0   :  { %s403_s9 = smov 0   ;;  %s405_s10 = smov 0   ;;  %s451_s0 = inlined_call_operand.vmem [shape: s32[32,1], index: 0, kind: input, shape index: {}]   ;;  %s452_s1 = inlined_call_operand.vmem [shape: f32[32,32], index: 1, kind: input, shape index: {}]   ;;  %s453_s2 = inlined_call_operand.vmem [shape: f32[32,1], index: 2, kind: output, shape index: {}]  }
   0x1   :  { %s407_s11 = smov 0  }
   0x2 LB: > { %s24_s12 = sadd.s32 1, %s379_s10  ;;  %p324_p0 = scmp.ge.s32.totalorder %s383_s11, 1  ;;  %s383_s11 = sphi %s407_s11, %s12_s11   ;;  %s379_s10 = sphi %s405_s10, %s455_s10   ;;  %s375_s9 = sphi %s403_s9, %s454_s9  }
   0x3   : > { %p26_p1 = scmp.ge.s32.totalorder %s24_s12, 2  ;;  %p144_p2 = scmp.lt.s32.totalorder %s383_s11, 3 }
   0x5   : > { %s457_s12 = smov (%p26_p1, %s24_s12), 0  ;;  %p145_p3 = pnand %p324_p0, %p144_p2 }
   0x6   : > { %s325_s13 = sshll.u32 (!%p145_p3), %s375_s9, 1  ;;  %v385_v0 = vmov (!%p145_p3), 0   ;;  %vm199_vm0 = vcmask (!%p145_p3), 7168   ;;  %v386_v1 = vmov (!%p145_p3), 0.0   ;;  %v206_v4 = vlaneseq (!%p145_p3) }
   0x7   : > { %148 = sbr.rel (%p145_p3) target bundleno = 304 (0x130), region = 28  ;;  %360 = vset.pattern.permute.xlu0 (!%p145_p3), %v385_v0  ;;  %p175_p4 = scmp.lt.s32.totalorder (!%p145_p3), %s325_s13, 3  ;;  %v387_v8 = vmov (!%p145_p3), -0.0033333334   ;;  %vm223_vm3 = vcmask (!%p145_p3), 261120  }
   0x8   : > { %v207_v5 = vand.u32 (!%p145_p3), 127, %v206_v4 }
   0xa   : > { %vm218_vm1 = vcmp.eq.s32.totalorder (!%p145_p3), %v207_v5, 0 }
   0xe   : > { %s459_s13 = smov (!%p175_p4, %s325_s13), 3 }
   0xf   : > { %s326_s14 = sshll.u32 %s459_s13, 3 }
  0x10   : > { %s178_s17 = scalar_lea.vmem %s451_s0, %s326_s14  ;;  %s427_s20 = scalar_lea.vmem %s453_s2, %s326_s14 }
  0x11   : > { %200 = vst.msk [vmem:[%s427_s20] sm:$0xff] %vm199_vm0, %v386_v1  ;;  %v204_v2 = vld [vmem:[%s178_s17] sm:$0xff]  ;;  %201 = vst.msk [vmem:[%s427_s20 + $0x8] sm:$0xff] %vm199_vm0, %v386_v1  ;;  %v205_v3 = vld [vmem:[%s178_s17 + $0x8] sm:$0xff]  ;;  %s186_s23 = scalar_lea.vmem %s452_s1, %s326_s14 }
  0x12   : > { %209 = vperm.xlu0 %360, %v204_v2   ;;  %v202_v7 = vld [vmem:[%s186_s23] sm:$0xff]  ;;  %v203_v13 = vld [vmem:[%s186_s23 + $0x8] sm:$0xff]  ;;  %vm232_vm5 = vcmp.eq.s32.totalorder %v204_v2, 0  ;;  %vm233_vm6 = vcmp.eq.s32.totalorder %v205_v3, 0 }
  0x16   : > { %212 = vperm.xlu0 %360, %v205_v3  }
  0x18   : > { %v236_v20 = vld [vmem:[%s427_s20] sm:$0xff]  ;;  %v237_v23 = vld [vmem:[%s427_s20 + $0x8] sm:$0xff] }
  0x91   : > { %v210_v6 = vpop.permute.xlu0 %209 }
  0x92   : > { %vm214_vm2 = vcmp.eq.s32.totalorder %v207_v5, %v210_v6 }
  0x93   : > { %v216_v9 = vsel %vm214_vm2, -0.9, %v387_v8 }
  0x94   : > { %v219_v10 = vsel %vm218_vm1, 0.0, %v216_v9 }
  0x95   : > { %v213_v11 = vpop.permute.xlu0 %212  ;;  %v221_v12 = vmul.f32 %v219_v10, %v202_v7 }
  0x96   : > { %vm215_vm4 = vcmp.eq.s32.totalorder %v207_v5, %v213_v11 }
  0x97   : > { %v217_v14 = vsel %vm215_vm4, -0.9, %v387_v8  ;;  %v224_v15 = vsel %vm223_vm3, %v221_v12, 0.0 }
  0x98   : > { %v220_v16 = vsel %vm218_vm1, 0.0, %v217_v14  ;;  %225 = vadd.xlane.f32.xlu1 %v224_v15 }
  0x99   : > { %v222_v17 = vmul.f32 %v220_v16, %v203_v13 }
  0x9b   : > { %v227_v18 = vsel %vm223_vm3, %v222_v17, 0.0 }
  0x9c   : > { %228 = vadd.xlane.f32.xlu1 %v227_v18 }
 0x125   : > { %v226_v19 = vpop.xlane.xlu1 %225 }
 0x126   : > { %v230_v21 = vadd.f32 -0.66520274, %v226_v19 }
 0x128   : > { %v234_v22 = vsel %vm232_vm5, 0.0, %v230_v21 }
 0x129   : > { %v238_v24 = vadd.f32 %v236_v20, %v234_v22  ;;  %v229_v25 = vpop.xlane.xlu1 %228 }
 0x12a   : > { %v231_v26 = vadd.f32 -0.66520274, %v229_v25 }
 0x12b   : > { %241 = vst.msk [vmem:[%s427_s20] sm:$0xff] %vm199_vm0, %v238_v24 }
 0x12c   : > { %v235_v27 = vsel %vm233_vm6, 0.0, %v231_v26 }
 0x12d   : > { %v239_v28 = vadd.f32 %v237_v23, %v235_v27 }
 0x12f   : > { %242 = vst.msk [vmem:[%s427_s20 + $0x8] sm:$0xff] %vm199_vm0, %v239_v28 }
 0x130 PF: > { %s12_s11 = sadd.s32 1, %s383_s11   ;;  %s454_s9 = smov %s379_s10 }
 0x131   : > { %p9_p5 = scmp.ge.s32.totalorder %s12_s11, 4   ;;  %s455_s10 = smov %s457_s12 }
 0x133   :  { %11 = sbr.rel (!%p9_p5) target bundleno = 2 (0x2), region = 65 }

</bundles_post_ra>
